<compile_context>
chip_gen: v6e
topology: v6e:2x2x1
jax: 0.10.0
libtpu: 0.0.40
codegen_flags: <defaults>
</compile_context>

<pallas_src>
import jax
import jax.numpy as jnp
from jax.experimental import pallas as pl
from jax.experimental.pallas import tpu as pltpu

_LANE = 128
_SUBLANE = 8
# Cap each VMEM tile at ~2 MiB: 2 x (in + out) double buffers <= ~8 MiB,
# comfortably inside every generation's scoped VMEM budget (incl. v7x).
_MAX_TILE_BYTES = 2 * 1024 * 1024


def _identity_kernel(x_ref, o_ref):
    # Bit-exact identity copy of the current tile.
    o_ref[...] = x_ref[...]


def _payload_shape(total):
    """Pick a lane/sublane-dense (rows, lanes) 2D shape for a bit-exact copy.

    Prefers the widest lane extent (multiple of 128, up to 8192) that keeps
    rows a multiple of 8, so tiles are full unmasked (8, 128) vregs and the
    tiling is independent of the batch size.
    """
    best = None
    lanes = _LANE
    while lanes <= 8192 and lanes <= total:
        if total % lanes == 0:
            rows = total // lanes
            if rows % _SUBLANE == 0:
                best = (rows, lanes)      # widest lane-aligned + sublane-aligned
            elif best is None:
                best = (rows, lanes)      # lane-aligned fallback
        lanes *= 2
    if best is None:
        # Degenerate size: single full-extent block (full-dim exception to
        # the (8, 128) rule).
        return 1, total
    return best


def _block_rows(rows, lanes, itemsize):
    """Largest multiple-of-8 divisor of `rows` whose tile fits the budget."""
    if rows % _SUBLANE != 0 or rows * lanes * itemsize <= _MAX_TILE_BYTES:
        return rows
    budget_rows = max(_SUBLANE, _MAX_TILE_BYTES // (lanes * itemsize))
    cand = (budget_rows // _SUBLANE) * _SUBLANE
    while cand > _SUBLANE and rows % cand != 0:
        cand -= _SUBLANE
    return cand if rows % cand == 0 else _SUBLANE


def _pallas_identity_copy(flat):
    """HBM-aliased, tiled identity copy of a flat 1-D array via Pallas."""
    total = flat.shape[0]
    rows, lanes = _payload_shape(total)
    x2d = jnp.reshape(flat, (rows, lanes))
    br = _block_rows(rows, lanes, x2d.dtype.itemsize)
    grid = (pl.cdiv(rows, br),)

    y2d = pl.pallas_call(
        _identity_kernel,
        out_shape=jax.ShapeDtypeStruct((rows, lanes), x2d.dtype),
        grid=grid,
        in_specs=[pl.BlockSpec((br, lanes), lambda i: (i, 0))],
        out_specs=pl.BlockSpec((br, lanes), lambda i: (i, 0)),
        # Output shares the input buffer: no extra HBM allocation, and the
        # "view" stays as close to zero-cost as a kernel boundary allows.
        input_output_aliases={0: 0},
        compiler_params=pltpu.CompilerParams(
            dimension_semantics=("parallel",),
        ),
    )(x2d)
    return jnp.reshape(y2d, (total,))


def lin_view(x, c, a, b):
    """JAX/Pallas equivalent of Lin_View(c, a, b).forward(x)."""
    total = x.size
    n = x.shape[0] if x.ndim >= 1 else 1
    # Mirror PyTorch's try/except with static shape arithmetic.
    if n * c * a * b == total:
        batch = n
    elif c * a * b == total:
        batch = 1
    else:
        raise ValueError("Lin_View: incompatible input size for view")

    flat = jnp.reshape(x, (total,))
    y = _pallas_identity_copy(flat)
    # Metadata-only reshape to NCHW.
    return jnp.reshape(y, (batch, c, a, b))


if __name__ == "__main__":
    key = jax.random.PRNGKey(0)
    N, C, A, B = 2, 4, 16, 16

    # Flat activation as produced by a preceding Linear layer: (N, C*A*B).
    x = jax.random.normal(key, (N, C * A * B), dtype=jnp.float32)

    lin_view_jit = jax.jit(lin_view, static_argnums=(1, 2, 3))
    y = jax.block_until_ready(lin_view_jit(x, C, A, B))

    ref = jnp.reshape(x, (N, C, A, B))
    assert y.shape == (N, C, A, B), y.shape
    assert y.dtype == x.dtype
    assert bool(jnp.all(y == ref))

    # Fallback path (batch -> 1), mirroring the PyTorch try/except.
    x1 = jax.random.normal(key, (C * A * B,), dtype=jnp.float32)
    y1 = jax.block_until_ready(lin_view_jit(x1, C, A, B))
    assert y1.shape == (1, C, A, B), y1.shape
    assert bool(jnp.all(y1 == jnp.reshape(x1, (1, C, A, B))))

    print("KERNEL_OK")
</pallas_src>

<mosaic_0001>
module attributes {stable_mosaic.version = 11 : i64} {
  func.func @_identity_kernel(%arg0: i32, %arg1: memref<8x256xf32, #tpu.memory_space<vmem>>, %arg2: memref<8x256xf32, #tpu.memory_space<vmem>>) attributes {dimension_semantics = [#tpu.dimension_semantics<parallel>], iteration_bounds = array<i64: 1>, scalar_prefetch = 0 : i64, scratch_operands = 0 : i64, tpu.core_type = #tpu.core_type<tc>, window_params = [{transform_indices = @transform_0, window_bounds = array<i64: 8, 256>}, {transform_indices = @transform_1, window_bounds = array<i64: 8, 256>}]} {
    %c0 = arith.constant 0 : index
    %c0_0 = arith.constant 0 : index
    %0 = vector.load %arg1[%c0, %c0_0] : memref<8x256xf32, #tpu.memory_space<vmem>>, vector<8x256xf32>
    %c0_1 = arith.constant 0 : index
    %c0_2 = arith.constant 0 : index
    %1 = vector.load %arg2[%c0_1, %c0_2] : memref<8x256xf32, #tpu.memory_space<vmem>>, vector<8x256xf32>
    tpu.vector_store %arg2[%c0_1, %c0_2], %0 {strides = array<i32>} : memref<8x256xf32, #tpu.memory_space<vmem>>, vector<8x256xf32>,
    return
  }
  func.func @transform_0(%arg0: i32) -> (i32, i32) {
    %c0_i32 = arith.constant 0 : i32
    %c0_i32_0 = arith.constant 0 : i32
    return %arg0, %c0_i32 : i32, i32
  }
  func.func @transform_1(%arg0: i32) -> (i32, i32) {
    %c0_i32 = arith.constant 0 : i32
    %c0_i32_0 = arith.constant 0 : i32
    return %arg0, %c0_i32 : i32, i32
  }
}

</mosaic_0001>

<bundles_post_ra>
// kernel: lin_view.1
= control target key start
LH: loop header
LB: loop body
LE: loop exit
PB: predicated region body
PF: predicated region fallthrough
CT: control target
= control target key end

     0   :  { %s38_s0 = inlined_call_operand.vmem [shape: f32[8,256], index: 0, kind: input, shape index: {}, may-alias: {0,1}]   ;;  %s39_s1 = inlined_call_operand.vmem [shape: f32[8,256], index: 1, kind: output, shape index: {}, may-alias: {0,1}]  }
   0x1   :  { %v8_v0 = vld [vmem:[%s38_s0] sm:$0xff]  ;;  %v9_v1 = vld [vmem:[%s38_s0 + $0x8] sm:$0xff] }
   0x2   :  { %10 = vst [vmem:[%s39_s1] sm:$0xff] %v8_v0  ;;  %11 = vst [vmem:[%s39_s1 + $0x8] sm:$0xff] %v9_v1 }

</bundles_post_ra>
